<compile_context>
chip_gen: v5e
topology: v5e:2x2
jax: 0.10.0
libtpu: 0.0.40
codegen_flags: <defaults>
</compile_context>

<pallas_src>
import math

import jax
import jax.numpy as jnp
from jax.experimental import pallas as pl
from jax.experimental.pallas import tpu as pltpu


def _round_up(x, m):
    return ((x + m - 1) // m) * m


def _cdiv(a, b):
    return -(-a // b)


def _physical_vmem_bytes():
    """Per-TensorCore VMEM capacity; conservative fallback if the query fails."""
    try:
        cap = getattr(pltpu.get_tpu_info(), "vmem_capacity_bytes", None)
        if cap:
            return int(cap)
    except Exception:
        pass
    return 64 << 20  # smallest of v5e/v6e/v7x -> always a safe assumption


def _decoder_kernel(x_ref, wf_ref, bf_ref, w1_ref, b1_ref, o_ref, h_ref):
    """Grid = (batch tiles, out_dim tiles); axis 1 (N) is the inner 'arbitrary' axis.

    h = ReLU(x @ W_fused + b_fused) is computed once per batch tile (j == 0)
    and kept in a VMEM scratch so the first matmul is not redone per N tile.
    """
    @pl.when(pl.program_id(1) == 0)
    def _():
        h = jnp.dot(x_ref[...].astype(wf_ref.dtype), wf_ref[...],
                    preferred_element_type=jnp.float32)
        h_ref[...] = jnp.maximum(h + bf_ref[...], 0.0).astype(h_ref.dtype)

    z = jnp.dot(h_ref[...], w1_ref[...], preferred_element_type=jnp.float32)
    z = z + b1_ref[...]
    # sigmoid(z) = 1 / (1 + exp(-z)); exp and approx reciprocal both use the EUP slot.
    o_ref[...] = pl.reciprocal(1.0 + jnp.exp(-z), approx=True).astype(o_ref.dtype)


def prepare_decoder_params(params, compute_dtype=jnp.bfloat16):
    """One-time parameter preparation (hoisted out of the per-call forward path).

    `restored` has no activation, so it is folded into hidden[0]:
        W_fused = Wr @ W0,   b_fused = br @ W0 + b0     (exact in f32).
    The fused/last weights are then cast once to the MXU compute dtype.
    """
    f32 = jnp.float32
    wr, br = params["wr"].astype(f32), params["br"].astype(f32)
    w0, b0 = params["w0"].astype(f32), params["b0"].astype(f32)
    wf = wr @ w0                       # (latent_dim, output_shape/2)
    bf = br @ w0 + b0                  # (1, output_shape/2)
    return {
        "wf": wf.astype(compute_dtype),
        "bf": bf,                                          # f32 bias row
        "w1": params["w1"].astype(compute_dtype),          # (out/2, out)
        "b1": params["b1"].astype(f32),                    # (1, out)
    }


def decoder_forward(x, prepared, *, out_dtype=jnp.bfloat16, max_block_batch=1024):
    """x: (B, latent_dim) f32; prepared: output of prepare_decoder_params."""
    B, latent_dim = x.shape
    wf, bf, w1, b1 = prepared["wf"], prepared["bf"], prepared["w1"], prepared["b1"]
    hid = wf.shape[1]
    out_dim = w1.shape[1]
    w_itemsize = jnp.dtype(wf.dtype).itemsize
    out_itemsize = jnp.dtype(out_dtype).itemsize

    vmem_cap = _physical_vmem_bytes()

    # ---- N (output-feature) tiling: keep W1 resident only when it comfortably fits.
    w1_bytes = hid * out_dim * w_itemsize
    tn = out_dim
    if out_dim > 2048 and w1_bytes > vmem_cap // 4:
        for cand in (1024, 768, 512, 384, 256, 128):
            if out_dim % cand == 0:
                tn = cand
                break
    num_n_tiles = out_dim // tn

    # ---- Batch tiling: multi-MiB output tiles; spread padding across tiles.
    target_tile_bytes = 2 << 20
    tb_target = max(256, min(max_block_batch,
                             target_tile_bytes // max(tn * out_itemsize, 1)))
    tb_target = _round_up(tb_target, 16)
    if B <= tb_target:
        tb = _round_up(B, 16)
    else:
        num_b_tiles = _cdiv(B, tb_target)
        tb = _round_up(_cdiv(B, num_b_tiles), 16)
    # Guarantee >=2 grid steps so the "parallel" axis shards across v7x's 2 TCs.
    if (_cdiv(B, tb) * num_n_tiles) < 2 and B >= 32:
        tb = _round_up(_cdiv(B, 2), 16)
    b_pad = _round_up(B, tb)
    num_b_tiles = b_pad // tb

    x_f32 = x.astype(jnp.float32)      # no-op when x is already f32
    if b_pad != B:
        x_f32 = jnp.pad(x_f32, ((0, b_pad - B), (0, 0)))

    # ---- VMEM budget: resident fused weights + double-buffered streamed tiles
    #      + h scratch, capped at 75% of physical VMEM.
    resident = wf.size * w_itemsize + bf.size * 4
    streamed_per_buf = (tb * latent_dim * 4          # x tile (f32)
                        + hid * tn * w_itemsize      # W1 tile
                        + tn * 4                     # b1 tile
                        + tb * tn * out_itemsize)    # output tile
    scratch_bytes = tb * hid * w_itemsize            # h scratch
    vmem_request = resident + 2 * streamed_per_buf + scratch_bytes + (2 << 20)
    vmem_cap_75 = (vmem_cap * 3) // 4
    vmem_limit = int(max(min(vmem_request, vmem_cap_75), min(16 << 20, vmem_cap_75)))

    flops = 2 * b_pad * (latent_dim * hid + hid * out_dim)
    transcendentals = 2 * b_pad * out_dim            # exp + reciprocal per element
    bytes_accessed = int(b_pad * latent_dim * 4
                         + resident
                         + hid * out_dim * w_itemsize + out_dim * 4
                         + b_pad * out_dim * out_itemsize)

    out = pl.pallas_call(
        _decoder_kernel,
        out_shape=jax.ShapeDtypeStruct((b_pad, out_dim), out_dtype),
        grid_spec=pltpu.PrefetchScalarGridSpec(
            num_scalar_prefetch=0,
            grid=(num_b_tiles, num_n_tiles),
            in_specs=[
                pl.BlockSpec((tb, latent_dim), lambda i, j: (i, 0)),   # x tile (f32)
                pl.BlockSpec((latent_dim, hid), lambda i, j: (0, 0)),  # fused W (resident)
                pl.BlockSpec((1, hid), lambda i, j: (0, 0)),           # fused b (resident)
                pl.BlockSpec((hid, tn), lambda i, j: (0, j)),          # W1 N-tile
                pl.BlockSpec((1, tn), lambda i, j: (0, j)),            # b1 N-tile
            ],
            out_specs=pl.BlockSpec((tb, tn), lambda i, j: (i, j)),
            scratch_shapes=[pltpu.VMEM((tb, hid), wf.dtype)],          # h scratch
        ),
        compiler_params=pltpu.CompilerParams(
            dimension_semantics=("parallel", "arbitrary"),
            vmem_limit_bytes=vmem_limit,
        ),
        cost_estimate=pl.CostEstimate(
            flops=flops,
            transcendentals=transcendentals,
            bytes_accessed=bytes_accessed,
        ),
    )(x_f32, wf, bf, w1, b1)

    return out[:B]


def init_decoder_params(key, output_shape, latent_dim, depth=2):
    """Mimics torch.nn.Linear default init (uniform +/- 1/sqrt(fan_in)).

    Weights are stored as (in_features, out_features) so the kernel computes
    x @ W + b; biases are (1, out_features) rows.
    """
    assert depth == 2, "kernel is specialized for the default depth=2"
    # TODO(synk): generalize wrapper to arbitrary depth (extra hidden ReLU layers).
    dims = {
        "wr": (latent_dim, output_shape // 4),
        "w0": (output_shape // 4, output_shape // 2),
        "w1": (output_shape // 2, output_shape),
    }
    params = {}
    for name, (fan_in, fan_out) in dims.items():
        key, kw, kb = jax.random.split(key, 3)
        bound = 1.0 / math.sqrt(fan_in)
        params[name] = jax.random.uniform(
            kw, (fan_in, fan_out), jnp.float32, -bound, bound)
        params["b" + name[1:]] = jax.random.uniform(
            kb, (1, fan_out), jnp.float32, -bound, bound)
    return params


def decoder_reference(x, params):
    """Pure-JAX f32 reference matching the PyTorch module exactly."""
    h = x @ params["wr"] + params["br"]
    h = jnp.maximum(h @ params["w0"] + params["b0"], 0.0)
    h = h @ params["w1"] + params["b1"]
    return jax.nn.sigmoid(h)


if __name__ == "__main__":
    # Small shapes consistent with the module: Decoder(output_shape=128, latent_dim=16)
    batch = 8
    latent_dim = 16
    output_shape = 128

    key = jax.random.PRNGKey(0)
    key, kx = jax.random.split(key)
    x = jax.random.normal(kx, (batch, latent_dim), jnp.float32)
    params = init_decoder_params(key, output_shape, latent_dim, depth=2)

    prepared = prepare_decoder_params(params)          # one-time weight prep
    out = decoder_forward(x, prepared)                 # bf16 output by default
    out = jax.block_until_ready(out)

    ref = decoder_reference(x, params)
    assert out.shape == (batch, output_shape)
    # bf16 weights + bf16 output + approx reciprocal => relaxed tolerance.
    err = jnp.max(jnp.abs(out.astype(jnp.float32) - ref))
    assert jnp.allclose(out.astype(jnp.float32), ref, atol=3e-2, rtol=3e-2), float(err)

    print("KERNEL_OK")
</pallas_src>

<mosaic_0001>
module attributes {stable_mosaic.version = 11 : i64} {
  func.func @_decoder_kernel(%arg0: i32, %arg1: i32, %arg2: memref<16x16xf32, #tpu.memory_space<vmem>>, %arg3: memref<16x64xbf16, #tpu.memory_space<vmem>>, %arg4: memref<1x64xf32, #tpu.memory_space<vmem>>, %arg5: memref<64x128xbf16, #tpu.memory_space<vmem>>, %arg6: memref<1x128xf32, #tpu.memory_space<vmem>>, %arg7: memref<16x128xbf16, #tpu.memory_space<vmem>>, %arg8: memref<16x64xbf16, #tpu.memory_space<vmem>>) attributes {dimension_semantics = [#tpu.dimension_semantics<parallel>, #tpu.dimension_semantics<arbitrary>], iteration_bounds = array<i64: 1, 1>, scalar_prefetch = 0 : i64, scratch_operands = 1 : i64, tpu.core_type = #tpu.core_type<tc>, window_params = [{transform_indices = @transform_0, window_bounds = array<i64: 16, 16>}, {pipeline_mode = #tpu.pipeline_mode<synchronous>, transform_indices = @transform_1, window_bounds = array<i64: 16, 64>}, {pipeline_mode = #tpu.pipeline_mode<synchronous>, transform_indices = @transform_2, window_bounds = array<i64: 1, 64>}, {transform_indices = @transform_3, window_bounds = array<i64: 64, 128>}, {transform_indices = @transform_4, window_bounds = array<i64: 1, 128>}, {transform_indices = @transform_5, window_bounds = array<i64: 16, 128>}]} {
    %c0_i32 = arith.constant 0 : i32
    %0 = arith.cmpi eq, %arg1, %c0_i32 : i32
    %1 = arith.extui %0 : i1 to i32
    %c0_i32_0 = arith.constant 0 : i32
    %2 = arith.cmpi ne, %1, %c0_i32_0 : i32
    scf.if %2 {
      %c0_10 = arith.constant 0 : index
      %c0_11 = arith.constant 0 : index
      %17 = vector.load %arg2[%c0_10, %c0_11] : memref<16x16xf32, #tpu.memory_space<vmem>>, vector<16x16xf32>
      %18 = arith.truncf %17 : vector<16x16xf32> to vector<16x16xbf16>
      %c0_12 = arith.constant 0 : index
      %c0_13 = arith.constant 0 : index
      %19 = vector.load %arg3[%c0_12, %c0_13] : memref<16x64xbf16, #tpu.memory_space<vmem>>, vector<16x64xbf16>
      %cst_14 = arith.constant dense<0.000000e+00> : vector<16x64xf32>
      %20 = tpu.matmul %18, %19, %cst_14 {dimension_numbers = #tpu.dot_dimension_numbers<[1], [0], [0], [1], [0, 0, 1, 1], [], []>} : vector<16x16xbf16>, vector<16x64xbf16>, vector<16x64xf32> -> vector<16x64xf32>
      %c0_15 = arith.constant 0 : index
      %c0_16 = arith.constant 0 : index
      %21 = vector.load %arg4[%c0_15, %c0_16] : memref<1x64xf32, #tpu.memory_space<vmem>>, vector<1x64xf32>
      %22 = vector.broadcast %21 : vector<1x64xf32> to vector<16x64xf32>
      %23 = arith.addf %20, %22 : vector<16x64xf32>
      %cst_17 = arith.constant 0.000000e+00 : f32
      %24 = vector.broadcast %cst_17 : f32 to vector<16x64xf32>
      %25 = arith.maximumf %23, %24 : vector<16x64xf32>
      %26 = arith.truncf %25 : vector<16x64xf32> to vector<16x64xbf16>
      %c0_18 = arith.constant 0 : index
      %c0_19 = arith.constant 0 : index
      %27 = vector.load %arg8[%c0_18, %c0_19] : memref<16x64xbf16, #tpu.memory_space<vmem>>, vector<16x64xbf16>
      tpu.vector_store %arg8[%c0_18, %c0_19], %26 {strides = array<i32>} : memref<16x64xbf16, #tpu.memory_space<vmem>>, vector<16x64xbf16>,
    } else {
    }
    %c0 = arith.constant 0 : index
    %c0_1 = arith.constant 0 : index
    %3 = vector.load %arg8[%c0, %c0_1] : memref<16x64xbf16, #tpu.memory_space<vmem>>, vector<16x64xbf16>
    %c0_2 = arith.constant 0 : index
    %c0_3 = arith.constant 0 : index
    %4 = vector.load %arg5[%c0_2, %c0_3] : memref<64x128xbf16, #tpu.memory_space<vmem>>, vector<64x128xbf16>
    %cst = arith.constant dense<0.000000e+00> : vector<16x128xf32>
    %5 = tpu.matmul %3, %4, %cst {dimension_numbers = #tpu.dot_dimension_numbers<[1], [0], [0], [1], [0, 0, 1, 1], [], []>} : vector<16x64xbf16>, vector<64x128xbf16>, vector<16x128xf32> -> vector<16x128xf32>
    %c0_4 = arith.constant 0 : index
    %c0_5 = arith.constant 0 : index
    %6 = vector.load %arg6[%c0_4, %c0_5] : memref<1x128xf32, #tpu.memory_space<vmem>>, vector<1x128xf32>
    %7 = vector.broadcast %6 : vector<1x128xf32> to vector<16x128xf32>
    %8 = arith.addf %5, %7 : vector<16x128xf32>
    %cst_6 = arith.constant 0.000000e+00 : f32
    %9 = vector.broadcast %cst_6 : f32 to vector<16x128xf32>
    %10 = arith.subf %9, %8 : vector<16x128xf32>
    %11 = math.exp %10 : vector<16x128xf32>
    %cst_7 = arith.constant 1.000000e+00 : f32
    %12 = vector.broadcast %cst_7 : f32 to vector<16x128xf32>
    %13 = arith.addf %12, %11 : vector<16x128xf32>
    %14 = tpu.reciprocal %13 {approx = true} : vector<16x128xf32> -> vector<16x128xf32>
    %15 = arith.truncf %14 : vector<16x128xf32> to vector<16x128xbf16>
    %c0_8 = arith.constant 0 : index
    %c0_9 = arith.constant 0 : index
    %16 = vector.load %arg7[%c0_8, %c0_9] : memref<16x128xbf16, #tpu.memory_space<vmem>>, vector<16x128xbf16>
    tpu.vector_store %arg7[%c0_8, %c0_9], %15 {strides = array<i32>} : memref<16x128xbf16, #tpu.memory_space<vmem>>, vector<16x128xbf16>,
    return
  }
  func.func @transform_0(%arg0: i32, %arg1: i32) -> (i32, i32) {
    %c0_i32 = arith.constant 0 : i32
    %c0_i32_0 = arith.constant 0 : i32
    return %arg0, %c0_i32 : i32, i32
  }
  func.func @transform_1(%arg0: i32, %arg1: i32) -> (i32, i32) {
    %c0_i32 = arith.constant 0 : i32
    %c0_i32_0 = arith.constant 0 : i32
    %c0_i32_1 = arith.constant 0 : i32
    return %c0_i32, %c0_i32_0 : i32, i32
  }
  func.func @transform_2(%arg0: i32, %arg1: i32) -> (i32, i32) {
    %c0_i32 = arith.constant 0 : i32
    %c0_i32_0 = arith.constant 0 : i32
    %c0_i32_1 = arith.constant 0 : i32
    return %c0_i32, %c0_i32_0 : i32, i32
  }
  func.func @transform_3(%arg0: i32, %arg1: i32) -> (i32, i32) {
    %c0_i32 = arith.constant 0 : i32
    %c0_i32_0 = arith.constant 0 : i32
    return %c0_i32, %arg1 : i32, i32
  }
  func.func @transform_4(%arg0: i32, %arg1: i32) -> (i32, i32) {
    %c0_i32 = arith.constant 0 : i32
    %c0_i32_0 = arith.constant 0 : i32
    return %c0_i32, %arg1 : i32, i32
  }
  func.func @transform_5(%arg0: i32, %arg1: i32) -> (i32, i32) {
    %c0_i32 = arith.constant 0 : i32
    return %arg0, %arg1 : i32, i32
  }
}

</mosaic_0001>

<bundles_post_ra>
// kernel: tpu_custom_call.1
= control target key start
LH: loop header
LB: loop body
LE: loop exit
PB: predicated region body
PF: predicated region fallthrough
CT: control target
= control target key end

     0   :  { %10 = vsyncpa [#allocation4], 0  ;;  %s430_s0 = inlined_call_operand.hbm [shape: f32[16,16], index: 0, kind: input, shape index: {}]   ;;  %s431_s1 = inlined_call_operand.hbm [shape: bf16[16,64], index: 1, kind: input, shape index: {}]   ;;  %s432_s2 = inlined_call_operand.vmem [shape: f32[1,64], index: 2, kind: input, shape index: {}]   ;;  %s433_s3 = inlined_call_operand.hbm [shape: bf16[64,128], index: 3, kind: input, shape index: {}]   ;;  %s434_s4 = inlined_call_operand.vmem [shape: f32[1,128], index: 4, kind: input, shape index: {}]   ;;  %s435_s5 = inlined_call_operand.hbm [shape: bf16[16,128], index: 5, kind: output, shape index: {}]  }
   0x1   :  { %11 = vsyncpa [#allocation7], 0  ;;  %s30_s20 = sshll.u32 %s431_s1, 4  ;;  %s31_s20 = int_to_ptr.hbm [resolvable:$true] %s30_s20 }
   0x2   :  { %12 = vsyncpa [#allocation5], 0  ;;  %s365_s21 = smov [#allocation6]   ;;  %s17_s25 = sshll.u32 %s430_s0, 4  ;;  %s18_s25 = int_to_ptr.hbm [resolvable:$true] %s17_s25 }
   0x3   :  { %s32_s22 = sshll.u32 %s365_s21, 4  ;;  %s366_s26 = smov 64   ;;  %s33_s22 = int_to_ptr.vmem [resolvable:$true] %s32_s22 }
   0x4   :  { %s367_s27 = smov 4   ;;  %s368_s28 = smov [#allocation3]  }
   0x5   :  { %38 = dma.hbm_to_vmem [thread:$0]  %s31_s20, 128, %s33_s22, [#allocation7], %s366_s26, %s366_s26, %s367_s27  }
   0x6   :  { %s19_s29 = sshll.u32 %s368_s28, 4  ;;  %s369_s1 = smov 128   ;;  %s20_s29 = int_to_ptr.vmem [resolvable:$true] %s19_s29 }
   0x7   :  { %s370_s30 = smov 8   ;;  %s45_s8 = sshll.u32 %s433_s3, 4  ;;  %s46_s8 = int_to_ptr.hbm [resolvable:$true] %s45_s8 }
   0x8   :  { %25 = dma.hbm_to_vmem [thread:$0]  %s18_s25, 256, %s20_s29, [#allocation4], %s369_s1, %s369_s1, %s370_s30  }
   0x9   :  { %s371_s9 = smov [#allocation8]  }
   0xa   :  { %s47_s0 = sshll.u32 %s371_s9, 4  ;;  %s48_s0 = int_to_ptr.vmem [resolvable:$true] %s47_s0 }
   0xb   :  { %53 = dma.hbm_to_vmem [thread:$0]  %s46_s8, 512, %s48_s0, [#allocation7], %s366_s26, %s366_s26, %s367_s27  }
   0xc   :  { %359 = dma.done.wait [#allocation4], 256  }
   0xd   :  { %360 = vsyncadd [#allocation4], 4294967040 }
   0xe   :  { %361 = dma.done.wait [#allocation7], 640  }
   0xf   :  { %362 = vsyncadd [#allocation7], 4294966656  ;;  %v234_v0 = vld [vmem:[#allocation6] sm:$0xff]  ;;  %v73_v1 = vld [vmem:[#allocation3] sm:$0xff]  ;;  %vm88_vm0 = vcmask 130048   ;;  %vm110_vm1 = vcmask 519168  }
  0x10   :  { %v74_v2 = vld [vmem:[#allocation3 + $0x8] sm:$0xff]  ;;  %99 = vmatpush.bf16.msra.mxu0 %v234_v0  ;;  %v239_v4 = vld [vmem:[#allocation8 + $0x18] sm:$0xff]  ;;  %v237_v6 = vld [vmem:[#allocation8 + $0x8] sm:$0xff]  ;;  %vm156_vm2 = vcmask 523264   ;;  %s194_s15 = sshll.u32 %s435_s5, 4  ;;  %s195_s15 = int_to_ptr.hbm [resolvable:$true] %s194_s15 }
  0x11   :  { %v75_v3 = vpack.c.bf16 %v74_v2, %v73_v1  ;;  %164 = vmatpush.bf16.msra.mxu1 %v239_v4  ;;  %v238_v5 = vld [vmem:[#allocation8 + $0x10] sm:$0xff]  ;;  %v236_v7 = vld [vmem:[#allocation8] sm:$0xff] }
  0x12   :  { %v253_v8 = vld [vmem:[%s432_s2] ss:$0 sm:$0xff]  ;;  %s372_s2 = smov [#allocation9]  }
  0x13   :  { %212 = vmatmul.msk.bf16.vlgmr.msra.gmra.mxu0 %vm88_vm0, %v75_v3  ;;  %v254_v18 = vld [vmem:[%s434_s4] ss:$0 sm:$0xff]  ;;  %s192_s13 = sshll.u32 %s372_s2, 4  ;;  %s193_s13 = int_to_ptr.vmem [resolvable:$true] %s192_s13 }
  0x15   :  { %165 = vmatpush.bf16.msra.mxu1 %v238_v5 }
  0x19   :  { %166 = vmatpush.bf16.msra.mxu1 %v237_v6 }
  0x1d   :  { %167 = vmatpush.bf16.msra.mxu1 %v236_v7 }
  0x90   :  { %v101_v9 = vpop.f32.mrf.mxu0 }
  0x91   :  { %v102_v10 = vadd.f32 %v253_v8, %v101_v9 }
  0x93   :  { %v106_v11 = vmax.f32 %v102_v10, 0.0 }
  0x95   :  { %v108_v12 = vpack.c.bf16 %v106_v11, %v106_v11 }
  0x97   :  { %111 = vst.msk [vmem:[#allocation2] sm:$0xf] %vm110_vm1, %v108_v12 }
  0x98   :  { %v103_v13 = vpop.f32.mrf.mxu0 }
  0x99   :  { %v104_v14 = vadd.f32 %v253_v8, %v103_v13 }
  0x9b   :  { %v107_v15 = vmax.f32 %v104_v14, 0.0 }
  0x9d   :  { %v109_v16 = vpack.c.bf16 %v107_v15, %v107_v15 }
  0x9f   :  { %112 = vst.msk [vmem:[#allocation2 + $0x4] sm:$0xf] %vm110_vm1, %v109_v16 }
  0xa6   :  { %v235_v17 = vld [vmem:[#allocation2] sm:$0xff] }
  0xa7   :  { %233 = vmatmul.msk.bf16.vlgmr.msra.gmra.mxu1 %vm156_vm2, %v235_v17 }
 0x124   :  { %v169_v19 = vpop.f32.mrf.mxu1 }
 0x125   :  { %v170_v20 = vadd.f32 %v254_v18, %v169_v19 }
 0x127   :  { %v174_v21 = vsub.f32 0.0, %v170_v20 }
 0x129   :  { %v176_v22 = vmul.f32 1.442695, %v174_v21 }
 0x12b   :  { %255 = vpow2.f32 %v176_v22 }
 0x12c   :  { %v171_v23 = vpop.f32.mrf.mxu1 }
 0x12d   :  { %v172_v24 = vadd.f32 %v254_v18, %v171_v23 }
 0x12f   :  { %v175_v25 = vsub.f32 0.0, %v172_v24 }
 0x131   :  { %v178_v26 = vmul.f32 1.442695, %v175_v25  ;;  %v256_v27 = vpop.eup %255 }
 0x132   :  { %v180_v28 = vadd.f32 1.0, %v256_v27 }
 0x133   :  { %257 = vpow2.f32 %v178_v26 }
 0x134   :  { %259 = vrcp.f32 %v180_v28 }
 0x139   :  { %v258_v29 = vpop.eup %257 }
 0x13a   :  { %v181_v30 = vadd.f32 1.0, %v258_v29  ;;  %v260_v31 = vpop.eup %259 }
 0x13c   :  { %261 = vrcp.f32 %v181_v30 }
 0x142   :  { %v262_v32 = vpop.eup %261 }
 0x143   :  { %v243_v33 = vpack.c.bf16 %v262_v32, %v260_v31 }
 0x145   :  { %244 = vst [vmem:[#allocation9] sm:$0xff] %v243_v33  }
 0x146   :  { %200 = dma.vmem_to_hbm [thread:$0]  %s193_s13, 128, %s195_s15, [#allocation5], %s366_s26, %s366_s26, %s367_s27  }
 0x147   :  { %363 = dma.done.wait [#allocation5], 128  }
 0x148   :  { %364 = vsyncadd [#allocation5], 4294967168 }
 0x149   :  { %205 = vsyncpa [#allocation4], 1 }
 0x14a   :  { %206 = vsyncpa [#allocation7], 1 }
 0x14b   :  { %207 = vsyncpa [#allocation5], 1 }

</bundles_post_ra>
